<compile_context>
chip_gen: v7x
topology: tpu7x:2x2x1
jax: 0.10.0
libtpu: 0.0.40
codegen_flags: <defaults>
</compile_context>

<pallas_src>
import math
from functools import partial

import jax
import jax.numpy as jnp
from jax import lax
from jax.experimental import pallas as pl
from jax.experimental.pallas import tpu as pltpu


def _build_ce_table(n_filters: int = 32, max_len: int = 80) -> jnp.ndarray:
    """Deterministic sinusoidal table, identical to the PyTorch __init__."""
    position = jnp.arange(0, max_len, dtype=jnp.float32)[:, None]          # (max_len, 1)
    div_term = jnp.exp(
        jnp.arange(0, n_filters, 2, dtype=jnp.float32)
        * -(math.log(10000.0) / n_filters)
    )                                                                      # (n_filters//2,)
    ang = position * div_term                                              # (max_len, n_filters//2)
    ce = jnp.zeros((max_len, n_filters), dtype=jnp.float32)
    ce = ce.at[:, 0::2].set(jnp.sin(ang))
    ce = ce.at[:, 1::2].set(jnp.cos(ang))
    return ce


def _gather_kernel(idx_ref, hi_ref, lo_ref, out_ref, *, pack: int, k_pad: int):
    # idx_ref:   (rt, pack)            int32 -- `pack` original rows per packed row
    # hi_ref/lo_ref: (pack*k_pad, pack*D) bf16 -- block-diagonal hi/lo halves of ce
    # out_ref:   (rt, pack*D)          f32   -- lane-dense output slab (pack*D == 128)
    idx = idx_ref[...]                                             # (rt, pack)
    rt = idx.shape[0]

    # Column iota built once per body (hoisted; JAX does not CSE broadcasts).
    col = lax.broadcasted_iota(jnp.int32, (rt, k_pad), 1)          # (rt, k_pad)

    # Block-structured one-hot, built directly in the matmul dtype (bf16; 0/1 exact).
    # Each part is a full 128-lane-aligned slab, so the lane-axis concatenate is
    # pure vreg placement (no copy loop).
    parts = [(col == idx[:, j:j + 1]).astype(jnp.bfloat16) for j in range(pack)]
    onehot = parts[0] if pack == 1 else jnp.concatenate(parts, axis=1)  # (rt, pack*k_pad)

    # Two accumulating bf16 MXU passes reproduce the f32 table (hi + lo) exactly
    # up to the hi/lo split rounding (~4e-6 absolute for |ce| <= 1).
    acc = jnp.dot(onehot, hi_ref[...], preferred_element_type=jnp.float32)
    acc = acc + jnp.dot(onehot, lo_ref[...], preferred_element_type=jnp.float32)
    out_ref[...] = acc.astype(out_ref.dtype)


def _choose_row_tile(rows: int, target: int = 1024, granule: int = 16) -> tuple[int, int]:
    """Pick (row_tile, padded_rows).

    Preference order:
      1. rt divides `rows` exactly  -> the wrapper un-pad slice is a no-op (no full
         XLA copy of the output),
      2. rt close to `target`       -> amortized grid-step overhead, long writeback DMAs,
      3. >=2 grid steps when large enough -> v7x's two TensorCores both get work.
    rt is always a multiple of `granule` (16: bf16 sublane packing and the (8, .) rule).
    """
    if rows % granule == 0:
        if rows <= target:
            if rows >= 2 * granule and rows % (2 * granule) == 0:
                return rows // 2, rows          # two equal tiles for v7x megacore
            return rows, rows                   # single tile, no padding
        cap = max(target - (target % granule), granule)
        for cand in range(cap, granule - 1, -granule):
            if rows % cand == 0:
                if cand >= 128 or rows <= 64 * granule:
                    return cand, rows           # exact divisor -> no padding
                break                           # divisor too small; pad instead
    # Fall back: pad rows up to a whole number of tiles (tail sliced in the wrapper).
    rt = min(target, -(-rows // granule) * granule)
    rows_pad = -(-rows // rt) * rt
    return rt, rows_pad


def category_encoding(categories: jnp.ndarray, ce_table: jnp.ndarray,
                      *, row_tile: int = 1024, out_dtype=None) -> jnp.ndarray:
    """categories: (B, L) int indices -> (B, L, D) encodings (out[b,l] = ce[cat[b,l]])."""
    B, L = categories.shape
    max_len, D = ce_table.shape
    out_dtype = jnp.dtype(out_dtype) if out_dtype is not None else jnp.dtype(jnp.float32)

    # Pad the gather (K) dim to a multiple of 128 lanes; padded rows are zero and
    # never selected since valid indices are < max_len.
    k_pad = ((max_len + 127) // 128) * 128

    # Pack `pack` consecutive flattened positions into one 128-lane output row.
    pack = 128 // D if (0 < D <= 128 and 128 % D == 0) else 1

    # hi/lo bf16 split of the f32 table (sum reproduces f32 to ~4e-6 absolute).
    ce_f32 = ce_table.astype(jnp.float32)
    ce_hi = ce_f32.astype(jnp.bfloat16)
    ce_lo = (ce_f32 - ce_hi.astype(jnp.float32)).astype(jnp.bfloat16)

    def block_diag(t):
        full = jnp.zeros((pack * k_pad, pack * D), dtype=jnp.bfloat16)
        for j in range(pack):
            full = full.at[j * k_pad:j * k_pad + max_len, j * D:(j + 1) * D].set(t)
        return full

    table_hi = block_diag(ce_hi)
    table_lo = block_diag(ce_lo)

    # Flatten indices into packed rows; pad only when unavoidable.
    n = B * L
    rows = -(-n // pack)
    rt, rows_pad = _choose_row_tile(rows, row_tile)

    idx_flat = categories.reshape(-1).astype(jnp.int32)
    padded = (rows_pad * pack != n)
    if padded:
        idx_flat = jnp.zeros((rows_pad * pack,), dtype=jnp.int32).at[:n].set(idx_flat)
    idx = idx_flat.reshape(rows_pad, pack)

    out = pl.pallas_call(
        partial(_gather_kernel, pack=pack, k_pad=k_pad),
        out_shape=jax.ShapeDtypeStruct((rows_pad, pack * D), out_dtype),
        grid_spec=pltpu.PrefetchScalarGridSpec(
            num_scalar_prefetch=0,
            grid=(rows_pad // rt,),
            in_specs=[
                pl.BlockSpec((rt, pack), lambda r: (r, 0)),                 # tiled indices
                pl.BlockSpec((pack * k_pad, pack * D), lambda r: (0, 0)),   # resident hi table
                pl.BlockSpec((pack * k_pad, pack * D), lambda r: (0, 0)),   # resident lo table
            ],
            out_specs=pl.BlockSpec((rt, pack * D), lambda r: (r, 0)),
        ),
        compiler_params=pltpu.CompilerParams(
            dimension_semantics=("parallel",),   # v7x: row tiles split across both TCs
        ),
    )(idx, table_hi, table_lo)

    # Undo packing / padding. When rows_pad*pack == n the reshape is a contiguous
    # bitcast and no slice (hence no XLA copy) is emitted.
    out_flat = out.reshape(rows_pad * pack, D)
    if padded:
        out_flat = out_flat[:n]
    return out_flat.reshape(B, L, D)


if __name__ == "__main__":
    n_filters, max_len = 32, 80
    B, L = 2, 8

    key = jax.random.PRNGKey(0)
    categories = jax.random.randint(key, (B, L), 0, max_len, dtype=jnp.int32)

    ce = _build_ce_table(n_filters=n_filters, max_len=max_len)

    out = category_encoding(categories, ce)
    out = jax.block_until_ready(out)

    # Pure-JAX reference: out[b] = ce[categories[b]]
    ref = ce[categories]
    assert out.shape == (B, L, n_filters), out.shape
    assert out.dtype == jnp.float32
    # bf16 hi/lo table split is ~f32-accurate (worst case ~4e-6 absolute for |ce|<=1).
    assert jnp.allclose(out, ref, atol=1e-5), "mismatch vs reference gather"

    print("KERNEL_OK")
</pallas_src>

<mosaic_0001>
module attributes {stable_mosaic.version = 11 : i64} {
  func.func @_gather_kernel(%arg0: i32, %arg1: memref<16x4xi32, #tpu.memory_space<vmem>>, %arg2: memref<512x128xbf16, #tpu.memory_space<vmem>>, %arg3: memref<512x128xbf16, #tpu.memory_space<vmem>>, %arg4: memref<16x128xf32, #tpu.memory_space<vmem>>) attributes {dimension_semantics = [#tpu.dimension_semantics<parallel>], iteration_bounds = array<i64: 1>, scalar_prefetch = 0 : i64, scratch_operands = 0 : i64, tpu.core_type = #tpu.core_type<tc>, window_params = [{transform_indices = @transform_0, window_bounds = array<i64: 16, 4>}, {pipeline_mode = #tpu.pipeline_mode<synchronous>, transform_indices = @transform_1, window_bounds = array<i64: 512, 128>}, {pipeline_mode = #tpu.pipeline_mode<synchronous>, transform_indices = @transform_2, window_bounds = array<i64: 512, 128>}, {transform_indices = @transform_3, window_bounds = array<i64: 16, 128>}]} {
    %c0 = arith.constant 0 : index
    %c0_0 = arith.constant 0 : index
    %0 = vector.load %arg1[%c0, %c0_0] : memref<16x4xi32, #tpu.memory_space<vmem>>, vector<16x4xi32>
    %1 = tpu.iota {dimensions = array<i32: 1>} : vector<16x128xi32>
    %2 = vector.extract_strided_slice %0 {offsets = [0, 0], sizes = [16, 1], strides = [1, 1]} : vector<16x4xi32> to vector<16x1xi32>
    %3 = vector.broadcast %2 : vector<16x1xi32> to vector<16x128xi32>
    %4 = arith.cmpi eq, %1, %3 : vector<16x128xi32>
    %5 = arith.extui %4 : vector<16x128xi1> to vector<16x128xi32>
    %6 = arith.sitofp %5 : vector<16x128xi32> to vector<16x128xf32>
    %7 = arith.truncf %6 : vector<16x128xf32> to vector<16x128xbf16>
    %8 = vector.extract_strided_slice %0 {offsets = [0, 1], sizes = [16, 1], strides = [1, 1]} : vector<16x4xi32> to vector<16x1xi32>
    %9 = vector.broadcast %8 : vector<16x1xi32> to vector<16x128xi32>
    %10 = arith.cmpi eq, %1, %9 : vector<16x128xi32>
    %11 = arith.extui %10 : vector<16x128xi1> to vector<16x128xi32>
    %12 = arith.sitofp %11 : vector<16x128xi32> to vector<16x128xf32>
    %13 = arith.truncf %12 : vector<16x128xf32> to vector<16x128xbf16>
    %14 = vector.extract_strided_slice %0 {offsets = [0, 2], sizes = [16, 1], strides = [1, 1]} : vector<16x4xi32> to vector<16x1xi32>
    %15 = vector.broadcast %14 : vector<16x1xi32> to vector<16x128xi32>
    %16 = arith.cmpi eq, %1, %15 : vector<16x128xi32>
    %17 = arith.extui %16 : vector<16x128xi1> to vector<16x128xi32>
    %18 = arith.sitofp %17 : vector<16x128xi32> to vector<16x128xf32>
    %19 = arith.truncf %18 : vector<16x128xf32> to vector<16x128xbf16>
    %20 = vector.extract_strided_slice %0 {offsets = [0, 3], sizes = [16, 1], strides = [1, 1]} : vector<16x4xi32> to vector<16x1xi32>
    %21 = vector.broadcast %20 : vector<16x1xi32> to vector<16x128xi32>
    %22 = arith.cmpi eq, %1, %21 : vector<16x128xi32>
    %23 = arith.extui %22 : vector<16x128xi1> to vector<16x128xi32>
    %24 = arith.sitofp %23 : vector<16x128xi32> to vector<16x128xf32>
    %25 = arith.truncf %24 : vector<16x128xf32> to vector<16x128xbf16>
    %26 = tpu.concatenate %7, %13, %19, %25 in 1 : vector<16x128xbf16>, vector<16x128xbf16>, vector<16x128xbf16>, vector<16x128xbf16> -> vector<16x512xbf16>
    %c0_1 = arith.constant 0 : index
    %c0_2 = arith.constant 0 : index
    %27 = vector.load %arg2[%c0_1, %c0_2] : memref<512x128xbf16, #tpu.memory_space<vmem>>, vector<512x128xbf16>
    %cst = arith.constant dense<0.000000e+00> : vector<16x128xf32>
    %28 = tpu.matmul %26, %27, %cst {dimension_numbers = #tpu.dot_dimension_numbers<[1], [0], [0], [1], [0, 0, 1, 1], [], []>} : vector<16x512xbf16>, vector<512x128xbf16>, vector<16x128xf32> -> vector<16x128xf32>
    %c0_3 = arith.constant 0 : index
    %c0_4 = arith.constant 0 : index
    %29 = vector.load %arg3[%c0_3, %c0_4] : memref<512x128xbf16, #tpu.memory_space<vmem>>, vector<512x128xbf16>
    %cst_5 = arith.constant dense<0.000000e+00> : vector<16x128xf32>
    %30 = tpu.matmul %26, %29, %cst_5 {dimension_numbers = #tpu.dot_dimension_numbers<[1], [0], [0], [1], [0, 0, 1, 1], [], []>} : vector<16x512xbf16>, vector<512x128xbf16>, vector<16x128xf32> -> vector<16x128xf32>
    %31 = arith.addf %28, %30 : vector<16x128xf32>
    %c0_6 = arith.constant 0 : index
    %c0_7 = arith.constant 0 : index
    %32 = vector.load %arg4[%c0_6, %c0_7] : memref<16x128xf32, #tpu.memory_space<vmem>>, vector<16x128xf32>
    tpu.vector_store %arg4[%c0_6, %c0_7], %31 {strides = array<i32>} : memref<16x128xf32, #tpu.memory_space<vmem>>, vector<16x128xf32>,
    return
  }
  func.func @transform_0(%arg0: i32) -> (i32, i32) {
    %c0_i32 = arith.constant 0 : i32
    %c0_i32_0 = arith.constant 0 : i32
    return %arg0, %c0_i32 : i32, i32
  }
  func.func @transform_1(%arg0: i32) -> (i32, i32) {
    %c0_i32 = arith.constant 0 : i32
    %c0_i32_0 = arith.constant 0 : i32
    %c0_i32_1 = arith.constant 0 : i32
    return %c0_i32, %c0_i32_0 : i32, i32
  }
  func.func @transform_2(%arg0: i32) -> (i32, i32) {
    %c0_i32 = arith.constant 0 : i32
    %c0_i32_0 = arith.constant 0 : i32
    %c0_i32_1 = arith.constant 0 : i32
    return %c0_i32, %c0_i32_0 : i32, i32
  }
  func.func @transform_3(%arg0: i32) -> (i32, i32) {
    %c0_i32 = arith.constant 0 : i32
    %c0_i32_0 = arith.constant 0 : i32
    return %arg0, %c0_i32 : i32, i32
  }
}

</mosaic_0001>

<bundles_post_ra>
// kernel: tpu_custom_call.1
= control target key start
LH: loop header
LB: loop body
LE: loop exit
PB: predicated region body
PF: predicated region fallthrough
CT: control target
= control target key end

     0   :  { %8 = vsyncpa [#allocation3], 0  ;;  %s1233_s0 = inlined_call_operand.vmem [shape: s32[16,4], index: 0, kind: input, shape index: {}]   ;;  %s1234_s1 = inlined_call_operand.hbm [shape: bf16[512,128], index: 1, kind: input, shape index: {}]   ;;  %s1235_s2 = inlined_call_operand.hbm [shape: bf16[512,128], index: 2, kind: input, shape index: {}]   ;;  %s1236_s3 = inlined_call_operand.hbm [shape: f32[16,128], index: 3, kind: output, shape index: {}]  }
   0x1   :  { %9 = vsyncpa [#allocation6], 0 }
   0x2   :  { %10 = vsyncpa [#allocation4], 0  ;;  %s1127_s12 = smov [#allocation2]   ;;  %s1055_s16 = scalar_lea.hbm %s1234_s1, 4096 }
   0x3   :  { %s18_s13 = sshll.u32 %s1127_s12, 4  ;;  %p1056_p0 = scmp.ne.s32.totalorder %s1234_s1, %s1055_s16  ;;  %s19_s13 = int_to_ptr.vmem [resolvable:$true] %s18_s13 }
   0x4   :  { %p1059_p1 = scmp.lt.u32.totalorder %s1055_s16, %s1234_s1 }
   0x6   :  { %p1061_p2 = pnand %p1059_p1, %p1056_p0 }
   0x8   :  { %1064 = shalt.err (!%p1061_p2)
}
   0x9   :  { %s1065_s21 = scalar_lea.vmem %s19_s13, 4096  ;;  %p1070_p4 = scmp.lt.s32.totalorder %s19_s13, %s19_s13 }
   0xa   :  { %p1066_p3 = scmp.ne.s32.totalorder %s19_s13, %s1065_s21  ;;  %p1071_p5 = scmp.lt.s32.totalorder %s1065_s21, %s1065_s21 }
   0xc   :  { %p1072_p6 = por %p1071_p5, %p1070_p4 }
   0xe   :  { %p1073_p7 = pnand %p1072_p6, %p1066_p3 }
  0x10   :  { %1076 = shalt.err (!%p1073_p7)
}
  0x11   :  { %s1128_s22 = smov 64   ;;  %s1129_s23 = smov 4  }
  0x12   :  { %24 = dma.hbm_to_vmem [thread:$0]  %s1234_s1, 4096, %s19_s13, [#allocation3], %s1128_s22, %s1128_s22, %s1129_s23  }
  0x13   :  { %s1130_s26 = smov [#allocation5]   ;;  %s1077_s30 = scalar_lea.hbm %s1235_s2, 4096 }
  0x14   :  { %s30_s27 = sshll.u32 %s1130_s26, 4  ;;  %p1078_p8 = scmp.ne.s32.totalorder %s1235_s2, %s1077_s30  ;;  %s31_s27 = int_to_ptr.vmem [resolvable:$true] %s30_s27 }
  0x15   :  { %p1081_p9 = scmp.lt.u32.totalorder %s1077_s30, %s1235_s2 }
  0x17   :  { %p1083_p10 = pnand %p1081_p9, %p1078_p8 }
  0x19   :  { %1086 = shalt.err (!%p1083_p10)
}
  0x1a   :  { %s1087_s8 = scalar_lea.vmem %s31_s27, 4096  ;;  %p1092_p12 = scmp.lt.s32.totalorder %s31_s27, %s31_s27 }
  0x1b   :  { %p1088_p11 = scmp.ne.s32.totalorder %s31_s27, %s1087_s8  ;;  %p1093_p13 = scmp.lt.s32.totalorder %s1087_s8, %s1087_s8 }
  0x1d   :  { %p1094_p0 = por %p1093_p13, %p1092_p12 }
  0x1f   :  { %p1095_p1 = pnand %p1094_p0, %p1088_p11 }
  0x21   :  { %1098 = shalt.err (!%p1095_p1)
}
  0x22   :  { %36 = dma.hbm_to_vmem [thread:$0]  %s1235_s2, 4096, %s31_s27, [#allocation6], %s1128_s22, %s1128_s22, %s1129_s23  }
  0x23   :  { %1121 = dma.done.wait [#allocation3], 4096  }
  0x24   :  { %1122 = vsyncadd [#allocation3], 4294963200 }
  0x25   :  { %1123 = dma.done.wait [#allocation6], 4096  }
  0x26   :  { %1124 = vsyncadd [#allocation6], 4294963200  ;;  %v1131_v0 = vmov 1   ;;  %v1132_v1 = vmov 0   ;;  %v44_v2 = vld [vmem:[%s1233_s0] sm:$0xff]  ;;  %v45_v3 = vld [vmem:[%s1233_s0 + $0x8] sm:$0xff]  ;;  %v46_v40 = vlaneseq }
  0x27   :  { %984 = vset.pattern.permute.xlu0 %v1131_v0  ;;  %985 = vset.pattern.permute.xlu1 %v1132_v1  ;;  %v991_v4 = vld [vmem:[#allocation5 + $0x40] sm:$0xff]   ;;  %v993_v6 = vld [vmem:[#allocation5 + $0x48] sm:$0xff]   ;;  %v995_v8 = vld [vmem:[#allocation5 + $0x50] sm:$0xff]   ;;  %v1133_v12 = vmov 3   ;;  %v1134_v18 = vmov 2   ;;  %s1136_s0 = smov [#allocation7]  }
  0x28   :  { %49 = vperm.xlu1 %985, %v44_v2   ;;  %62 = vperm.xlu0 %984, %v44_v2   ;;  %v992_v5 = vld [vmem:[#allocation5] sm:$0xff]   ;;  %v994_v7 = vld [vmem:[#allocation5 + $0x8] sm:$0xff]   ;;  %v996_v9 = vld [vmem:[#allocation5 + $0x10] sm:$0xff]   ;;  %v47_v43 = vand.u32 127, %v46_v40  ;;  %v1135_v49 = vmov 1.0|1.0  }
  0x29   :  { %884 = vmatprep.subr.bf16.mxu0 %v991_v4  ;;  %v997_v10 = vld [vmem:[#allocation5 + $0xc0] sm:$0xff]   ;;  %v999_v13 = vld [vmem:[#allocation5 + $0x58] sm:$0xff]   ;;  %v1001_v15 = vld [vmem:[#allocation5 + $0xc8] sm:$0xff]   ;;  %s783_s2 = sshll.u32 %s1136_s0, 4  ;;  %s784_s2 = int_to_ptr.vmem [resolvable:$true] %s783_s2 }
  0x2a   :  { %885 = vmatpush3.bf16.msra.mxu0 %v992_v5  ;;  %v998_v11 = vld [vmem:[#allocation5 + $0x80] sm:$0xff]   ;;  %v1000_v14 = vld [vmem:[#allocation5 + $0x18] sm:$0xff]   ;;  %906 = vmatprep.subr.bf16.mxu1 %v997_v10  ;;  %v1002_v16 = vld [vmem:[#allocation5 + $0x88] sm:$0xff]   ;;  %s1099_s14 = scalar_lea.vmem %s784_s2, 256  ;;  %p1104_p3 = scmp.lt.s32.totalorder %s784_s2, %s784_s2 }
  0x2b   :  { %886 = vmatprep.subr.bf16.mxu0 %v993_v6  ;;  %907 = vmatpush3.bf16.msra.mxu1 %v998_v11  ;;  %v1003_v17 = vld [vmem:[#allocation5 + $0x60] sm:$0xff]   ;;  %v1005_v20 = vld [vmem:[#allocation5 + $0xd0] sm:$0xff]   ;;  %v1007_v22 = vld [vmem:[#allocation5 + $0x68] sm:$0xff]   ;;  %p1100_p2 = scmp.ne.s32.totalorder %s784_s2, %s1099_s14  ;;  %p1105_p4 = scmp.lt.s32.totalorder %s1099_s14, %s1099_s14 }
  0x2c   :  { %52 = vperm.xlu1 %985, %v45_v3   ;;  %65 = vperm.xlu0 %984, %v45_v3   ;;  %v1004_v19 = vld [vmem:[#allocation5 + $0x20] sm:$0xff]   ;;  %v1006_v21 = vld [vmem:[#allocation5 + $0x90] sm:$0xff]   ;;  %v1008_v23 = vld [vmem:[#allocation5 + $0x28] sm:$0xff]  }
  0x2d   :  { %908 = vmatprep.subr.bf16.mxu1 %v1001_v15  ;;  %v1009_v24 = vld [vmem:[#allocation5 + $0xd8] sm:$0xff]   ;;  %v1011_v26 = vld [vmem:[#allocation5 + $0x70] sm:$0xff]   ;;  %v1013_v28 = vld [vmem:[#allocation5 + $0xe0] sm:$0xff]   ;;  %p1106_p5 = por %p1105_p4, %p1104_p3 }
  0x2e   :  { %887 = vmatpush3.bf16.msra.mxu0 %v994_v7  ;;  %v1010_v25 = vld [vmem:[#allocation5 + $0x98] sm:$0xff]   ;;  %v1012_v27 = vld [vmem:[#allocation5 + $0x30] sm:$0xff]   ;;  %v1014_v29 = vld [vmem:[#allocation5 + $0xa0] sm:$0xff]  }
  0x2f   :  { %888 = vmatprep.subr.bf16.mxu0 %v995_v8  ;;  %909 = vmatpush3.bf16.msra.mxu1 %v1002_v16  ;;  %v1015_v30 = vld [vmem:[#allocation5 + $0x78] sm:$0xff]   ;;  %v1017_v32 = vld [vmem:[#allocation5 + $0xe8] sm:$0xff]   ;;  %v1019_v34 = vld [vmem:[#allocation2 + $0x40] sm:$0xff]   ;;  %p1107_p6 = pnand %p1106_p5, %p1100_p2 }
  0x30   :  { %987 = vset.pattern.permute.xlu1 %v1133_v12  ;;  %986 = vset.pattern.permute.xlu0 %v1133_v12  ;;  %v1016_v31 = vld [vmem:[#allocation5 + $0x38] sm:$0xff]   ;;  %v1018_v33 = vld [vmem:[#allocation5 + $0xa8] sm:$0xff]   ;;  %v1020_v35 = vld [vmem:[#allocation5 + $0xf0] sm:$0xff]  }
  0x31   :  { %91 = vperm.xlu1 %987, %v45_v3   ;;  %88 = vperm.xlu0 %986, %v44_v2   ;;  %v1022_v36 = vld [vmem:[#allocation5 + $0xb0] sm:$0xff]   ;;  %v1024_v37 = vld [vmem:[#allocation5 + $0xf8] sm:$0xff]   ;;  %v1029_v39 = vld [vmem:[#allocation2 + $0xc0] sm:$0xff]  }
  0x32   :  { %889 = vmatpush3.bf16.msra.mxu0 %v996_v9  ;;  %910 = vmatprep.subr.bf16.mxu1 %v1005_v20  ;;  %v1026_v38 = vld [vmem:[#allocation5 + $0xb8] sm:$0xff]   ;;  %v1021_v47 = vld [vmem:[#allocation2] sm:$0xff]   ;;  %v1023_v48 = vld [vmem:[#allocation2 + $0x48] sm:$0xff]  }
  0x33   :  { %890 = vmatprep.subr.bf16.mxu0 %v999_v13  ;;  %911 = vmatpush3.bf16.msra.mxu1 %v1006_v21  ;;  %v1025_v52 = vld [vmem:[#allocation2 + $0x8] sm:$0xff]   ;;  %v1027_v54 = vld [vmem:[#allocation2 + $0x50] sm:$0xff]   ;;  %v1030_v58 = vld [vmem:[#allocation2 + $0x80] sm:$0xff]  }
  0x34   :  { %912 = vmatprep.subr.bf16.mxu1 %v1009_v24  ;;  %v1028_v57 = vld [vmem:[#allocation2 + $0x10] sm:$0xff]   ;;  %v1031_v59 = vld [vmem:[#allocation2 + $0x58] sm:$0xff]   ;;  %v1033_v61 = vld [vmem:[#allocation2 + $0xc8] sm:$0xff]  }
  0x35   :  { %988 = vset.pattern.permute.xlu1 %v1134_v18  ;;  %989 = vset.pattern.permute.xlu0 %v1134_v18  ;;  %v1032_v62 = vld [vmem:[#allocation2 + $0x18] sm:$0xff]   ;;  %v1034_v63 = vld [vmem:[#allocation2 + $0x88] sm:$0xff]   ;;  %v1035_v0 = vld [vmem:[#allocation2 + $0x60] sm:$0xff]  }
  0x36   :  { %75 = vperm.xlu1 %988, %v44_v2   ;;  %78 = vperm.xlu0 %989, %v45_v3   ;;  %v1037_v1 = vld [vmem:[#allocation2 + $0xd0] sm:$0xff]   ;;  %v1036_v2 = vld [vmem:[#allocation2 + $0x20] sm:$0xff]   ;;  %v1039_v4 = vld [vmem:[#allocation2 + $0x68] sm:$0xff]  }
  0x37   :  { %891 = vmatpush3.bf16.msra.mxu0 %v1000_v14  ;;  %913 = vmatpush3.bf16.msra.mxu1 %v1010_v25  ;;  %v1038_v3 = vld [vmem:[#allocation2 + $0x90] sm:$0xff]   ;;  %v1041_v5 = vld [vmem:[#allocation2 + $0xd8] sm:$0xff]   ;;  %v1040_v6 = vld [vmem:[#allocation2 + $0x28] sm:$0xff]  }
  0x38   :  { %892 = vmatprep.subr.bf16.mxu0 %v1003_v17  ;;  %914 = vmatprep.subr.bf16.mxu1 %v1013_v28  ;;  %v1042_v7 = vld [vmem:[#allocation2 + $0x98] sm:$0xff]   ;;  %v1043_v8 = vld [vmem:[#allocation2 + $0x70] sm:$0xff]   ;;  %v1045_v9 = vld [vmem:[#allocation2 + $0xe0] sm:$0xff]  }
  0x39   :  { %v1044_v10 = vld [vmem:[#allocation2 + $0x30] sm:$0xff]   ;;  %v1046_v11 = vld [vmem:[#allocation2 + $0xa0] sm:$0xff]   ;;  %v1049_v13 = vld [vmem:[#allocation2 + $0xe8] sm:$0xff]  }
  0x3a   :  { %990 = vset.pattern.permute.xlu0 %v1133_v12  ;;  %v1047_v12 = vld [vmem:[#allocation2 + $0x78] sm:$0xff]   ;;  %v1050_v15 = vld [vmem:[#allocation2 + $0xa8] sm:$0xff]   ;;  %v1051_v16 = vld [vmem:[#allocation2 + $0xf0] sm:$0xff]  }
  0x3b   :  { %893 = vmatpush3.bf16.msra.mxu0 %v1004_v19  ;;  %915 = vmatpush3.bf16.msra.mxu1 %v1014_v29  ;;  %v1048_v14 = vld [vmem:[#allocation2 + $0x38] sm:$0xff]   ;;  %v1052_v17 = vld [vmem:[#allocation2 + $0xb0] sm:$0xff]  }
  0x3c   :  { %894 = vmatprep.subr.bf16.mxu0 %v1007_v22  ;;  %916 = vmatprep.subr.bf16.mxu1 %v1017_v32  ;;  %v1053_v18 = vld [vmem:[#allocation2 + $0xf8] sm:$0xff]  }
  0x3d   :  { %v1054_v19 = vld [vmem:[#allocation2 + $0xb8] sm:$0xff]  }
  0x3f   :  { %895 = vmatpush3.bf16.msra.mxu0 %v1008_v23  ;;  %917 = vmatpush3.bf16.msra.mxu1 %v1018_v33 }
  0x40   :  { %896 = vmatprep.subr.bf16.mxu0 %v1011_v26  ;;  %918 = vmatprep.subr.bf16.mxu1 %v1020_v35 }
  0x43   :  { %897 = vmatpush3.bf16.msra.mxu0 %v1012_v27  ;;  %919 = vmatpush3.bf16.msra.mxu1 %v1022_v36 }
  0x44   :  { %898 = vmatprep.subr.bf16.mxu0 %v1015_v30  ;;  %920 = vmatprep.subr.bf16.mxu1 %v1024_v37 }
  0x47   :  { %899 = vmatpush3.bf16.msra.mxu0 %v1016_v31  ;;  %921 = vmatpush3.bf16.msra.mxu1 %v1026_v38 }
  0x48   :  { %928 = vmatprep.subr.bf16.mxu0 %v1019_v34  ;;  %950 = vmatprep.subr.bf16.mxu1 %v1029_v39 }
  0xa7   :  { %v50_v41 = vpop.permute.xlu1 %49  ;;  %v63_v42 = vpop.permute.xlu0 %62 }
  0xa8   :  { %vm54_vm0 = vcmp.eq.s32.totalorder %v47_v43, %v50_v41  ;;  %vm67_vm3 = vcmp.eq.s32.totalorder %v47_v43, %v63_v42 }
  0xab   :  { %v53_v44 = vpop.permute.xlu1 %52  ;;  %v66_v45 = vpop.permute.xlu0 %65 }
  0xac   :  { %vm55_vm1 = vcmp.eq.s32.totalorder %v47_v43, %v53_v44  ;;  %vm68_vm2 = vcmp.eq.s32.totalorder %v47_v43, %v66_v45 }
  0xad   :  { %vm1189_vm4 = vmpackc.low %vm55_vm1, %vm54_vm0 }
  0xae   :  { %vm836_vm5 = vmpackc.low %vm68_vm2, %vm67_vm3 }
  0xaf   :  { %837 = vmatprep.mubr.msk.bf16.mxu0 %vm836_vm5, %v1135_v49 }
  0xb0   :  { %839 = vmatmul.mubr.msk.bf16.vlgmr.msra.gmra.mrb[0].mxu0 %vm1189_vm4, %v1135_v49  ;;  %v92_v50 = vpop.permute.xlu1 %91  ;;  %v89_v51 = vpop.permute.xlu0 %88 }
  0xb1   :  { %929 = vmatpush3.bf16.msra.mxu0 %v1021_v47  ;;  %vm94_vm6 = vcmp.eq.s32.totalorder %v47_v43, %v92_v50  ;;  %877 = vmatprep.mubr.msk.bf16.mxu0 %vm836_vm5, %v1135_v49  ;;  %vm93_vm7 = vcmp.eq.s32.totalorder %v47_v43, %v89_v51 }
  0xb2   :  { %930 = vmatprep.subr.bf16.mxu0 %v1023_v48  ;;  %vm1198_vm8 = vmpackc.low %vm94_vm6, %vm93_vm7 }
  0xb3   :  { %841 = vmatprep.mubr.msk.bf16.mxu1 %vm1198_vm8, %v1135_v49 }
  0xb5   :  { %931 = vmatpush3.bf16.msra.mxu0 %v1025_v52  ;;  %v76_v55 = vpop.permute.xlu1 %75  ;;  %v79_v56 = vpop.permute.xlu0 %78 }
  0xb6   :  { %vm80_vm9 = vcmp.eq.s32.totalorder %v47_v43, %v76_v55  ;;  %vm81_vm10 = vcmp.eq.s32.totalorder %v47_v43, %v79_v56  ;;  %932 = vmatprep.subr.bf16.mxu0 %v1027_v54 }
  0xb7   :  { %vm1205_vm11 = vmpackc.low %vm81_vm10, %vm80_vm9 }
  0xb8   :  { %843 = vmatmul.mubr.msk.bf16.vlgmr.msra.gmra.mrb[0].mxu1 %vm1205_vm11, %v1135_v49 }
  0xb9   :  { %933 = vmatpush3.bf16.msra.mxu0 %v1028_v57  ;;  %951 = vmatpush3.bf16.msra.mxu1 %v1030_v58 }
  0xba   :  { %881 = vmatprep.mubr.msk.bf16.mxu1 %vm1198_vm8, %v1135_v49  ;;  %934 = vmatprep.subr.bf16.mxu0 %v1031_v59 }
  0xbb   :  { %952 = vmatprep.subr.bf16.mxu1 %v1033_v61 }
  0xbd   :  { %935 = vmatpush3.bf16.msra.mxu0 %v1032_v62  ;;  %953 = vmatpush3.bf16.msra.mxu1 %v1034_v63 }
  0xbe   :  { %936 = vmatprep.subr.bf16.mxu0 %v1035_v0  ;;  %954 = vmatprep.subr.bf16.mxu1 %v1037_v1 }
  0xc1   :  { %937 = vmatpush3.bf16.msra.mxu0 %v1036_v2  ;;  %955 = vmatpush3.bf16.msra.mxu1 %v1038_v3 }
  0xc2   :  { %938 = vmatprep.subr.bf16.mxu0 %v1039_v4  ;;  %956 = vmatprep.subr.bf16.mxu1 %v1041_v5 }
  0xc5   :  { %939 = vmatpush3.bf16.msra.mxu0 %v1040_v6  ;;  %957 = vmatpush3.bf16.msra.mxu1 %v1042_v7 }
  0xc6   :  { %940 = vmatprep.subr.bf16.mxu0 %v1043_v8  ;;  %958 = vmatprep.subr.bf16.mxu1 %v1045_v9 }
  0xc9   :  { %941 = vmatpush3.bf16.msra.mxu0 %v1044_v10  ;;  %959 = vmatpush3.bf16.msra.mxu1 %v1046_v11 }
  0xca   :  { %942 = vmatprep.subr.bf16.mxu0 %v1047_v12  ;;  %960 = vmatprep.subr.bf16.mxu1 %v1049_v13 }
  0xcd   :  { %943 = vmatpush3.bf16.msra.mxu0 %v1048_v14  ;;  %961 = vmatpush3.bf16.msra.mxu1 %v1050_v15 }
  0xce   :  { %962 = vmatprep.subr.bf16.mxu1 %v1051_v16 }
  0xd0   :  { %879 = vmatmul.mubr.msk.bf16.vlgmr.msra.gmra.mrb[4].mxu0 %vm1189_vm4, %v1135_v49 }
  0xd1   :  { %963 = vmatpush3.bf16.msra.mxu1 %v1052_v17 }
  0xd2   :  { %964 = vmatprep.subr.bf16.mxu1 %v1053_v18 }
  0xd5   :  { %965 = vmatpush3.bf16.msra.mxu1 %v1054_v19 }
  0xd8   :  { %883 = vmatmul.mubr.msk.bf16.vlgmr.msra.gmra.mrb[4].mxu1 %vm1205_vm11, %v1135_v49 }
 0x183   :  { %v900_v20 = vpop.f32.mrb[0].mxu0 }
 0x184   :  { %v901_v21 = vpop.f32.mrb[1].mxu0 }
 0x185   :  { %v902_v22 = vadd.f32 %v901_v21, %v900_v20  ;;  %v903_v23 = vpop.f32.mrb[2].mxu0 }
 0x186   :  { %v904_v24 = vpop.f32.mrb[3].mxu0 }
 0x187   :  { %v905_v25 = vadd.f32 %v904_v24, %v903_v23 }
 0x18b   :  { %v922_v26 = vpop.f32.mrb[0].mxu1 }
 0x18c   :  { %v923_v27 = vpop.f32.mrb[1].mxu1 }
 0x18d   :  { %v924_v28 = vadd.f32 %v923_v27, %v922_v26  ;;  %v925_v29 = vpop.f32.mrb[2].mxu1 }
 0x18e   :  { %v926_v30 = vpop.f32.mrb[3].mxu1 }
 0x18f   :  { %v496_v31 = vadd.f32 %v924_v28, %v902_v22  ;;  %v927_v32 = vadd.f32 %v926_v30, %v925_v29 }
 0x191   :  { %v499_v33 = vadd.f32 %v927_v32, %v905_v25 }
 0x1a3   :  { %v944_v34 = vpop.f32.mrb[4].mxu0 }
 0x1a4   :  { %v945_v35 = vpop.f32.mrb[5].mxu0 }
 0x1a5   :  { %v946_v36 = vadd.f32 %v945_v35, %v944_v34  ;;  %v947_v37 = vpop.f32.mrb[6].mxu0 }
 0x1a6   :  { %v948_v38 = vpop.f32.mrb[7].mxu0 }
 0x1a7   :  { %v729_v39 = vadd.f32 %v946_v36, %v496_v31  ;;  %v949_v40 = vadd.f32 %v948_v38, %v947_v37 }
 0x1a9   :  { %v732_v41 = vadd.f32 %v949_v40, %v499_v33 }
 0x1ab   :  { %v966_v42 = vpop.f32.mrb[4].mxu1 }
 0x1ac   :  { %v967_v43 = vpop.f32.mrb[5].mxu1 }
 0x1ad   :  { %v968_v44 = vadd.f32 %v967_v43, %v966_v42  ;;  %v969_v45 = vpop.f32.mrb[6].mxu1 }
 0x1ae   :  { %v970_v46 = vpop.f32.mrb[7].mxu1 }
 0x1af   :  { %v770_v47 = vadd.f32 %v968_v44, %v729_v39  ;;  %v971_v48 = vadd.f32 %v970_v46, %v969_v45 }
 0x1b1   :  { %776 = vst [vmem:[#allocation7] sm:$0xff] %v770_v47  ;;  %v773_v49 = vadd.f32 %v971_v48, %v732_v41 }
 0x1b3   :  { %777 = vst [vmem:[#allocation7 + $0x8] sm:$0xff] %v773_v49 }
 0x1b4   :  { %1110 = shalt.err (!%p1107_p6)
}
 0x1b5   :  { %s1111_s17 = scalar_lea.hbm %s1236_s3, 256 }
 0x1b6   :  { %p1112_p7 = scmp.ne.s32.totalorder %s1236_s3, %s1111_s17  ;;  %p1115_p8 = scmp.lt.u32.totalorder %s1111_s17, %s1236_s3 }
 0x1b8   :  { %p1117_p9 = pnand %p1115_p8, %p1112_p7 }
 0x1ba   :  { %1120 = shalt.err (!%p1117_p9)
}
 0x1bb   :  { %s1137_s22 = smov 128   ;;  %s1138_s23 = smov 8  }
 0x1bc   :  { %789 = dma.vmem_to_hbm [thread:$0]  %s784_s2, 256, %s1236_s3, [#allocation4], %s1137_s22, %s1137_s22, %s1138_s23  }
 0x1bd   :  { %1125 = dma.done.wait [#allocation4], 256  }
 0x1be   :  { %1126 = vsyncadd [#allocation4], 4294967040 }
 0x1bf   :  { %793 = vsyncpa [#allocation3], 1 }
 0x1c0   :  { %794 = vsyncpa [#allocation6], 1 }
 0x1c1   :  { %795 = vsyncpa [#allocation4], 1 }

</bundles_post_ra>
